<compile_context>
chip_gen: v6e
topology: v6e:2x2x1
jax: 0.10.0
libtpu: 0.0.40
codegen_flags: <defaults>
</compile_context>

<pallas_src>
import functools

import jax
import jax.numpy as jnp
from jax.experimental import pallas as pl
from jax.experimental.pallas import tpu as pltpu

GCN_LAYERS = 3  # canonical STSGCN config for args.gcn_num


def _stsgcl_kernel(x0_ref, x1_ref, x2_ref, a_ref, temb_ref, semb_ref,
                   w1_ref, b1_ref, w2_ref, b2_ref, w3_ref, b3_ref,
                   out_ref, *, B, N, H):
    """One grid step == one temporal window i (i in [0, T-3])."""
    i = pl.program_id(0)
    A = a_ref[...]                    # (3N, 3N)  bf16, resident across windows
    semb = semb_ref[...]              # (N, B*C)  f32, batch-tiled spatial emb

    # ---- build the window slab: h[k*N + n, b*C + c] = x[b, i+k, n, c] + temb + semb
    rows = []
    for k, xr in enumerate((x0_ref, x1_ref, x2_ref)):
        tk = temb_ref[pl.ds(i + k, 1), :]          # (1, B*C) temporal emb, row i+k
        rows.append(xr[...] + tk + semb)           # one vectorized add per timestep
    h = jnp.concatenate(rows, axis=0)              # (3N, B*C) f32, lanes = (b, c)

    mids = []
    for w_ref, b_ref in ((w1_ref, b1_ref), (w2_ref, b2_ref), (w3_ref, b3_ref)):
        W = w_ref[i]                               # (Cin, 2H) bf16, per-window weights
        bvec = b_ref[i]                            # (1, 2H)   f32
        cin = W.shape[0]

        # graph conv: all batches in a single lane-dense MXU matmul
        g = jnp.dot(A, h.astype(jnp.bfloat16),
                    preferred_element_type=jnp.float32)            # (3N, B*Cin) f32
        # refold lanes -> rows: (3N, B*Cin) -> (B*3N, Cin), batch-major rows
        g_rows = jnp.concatenate(
            [g[:, b * cin:(b + 1) * cin] for b in range(B)], axis=0)
        # FC: all batches in a single matmul
        z = jnp.dot(g_rows.astype(jnp.bfloat16), W,
                    preferred_element_type=jnp.float32) + bvec     # (B*3N, 2H) f32
        hr = z[:, :H] * jax.nn.sigmoid(z[:, H:])                   # GLU (f32)
        # refold rows -> lanes: (B*3N, H) -> (3N, B*H)
        h = jnp.concatenate(
            [hr[b * 3 * N:(b + 1) * 3 * N, :] for b in range(B)], axis=1)
        mids.append(h[N:2 * N, :])                 # middle N vertices, (N, B*H)

    # layer-wise max over the middle block; single lane-folded store per window
    out_ref[...] = jnp.maximum(jnp.maximum(mids[0], mids[1]), mids[2])


def stsgcl_forward(x, A, temb, semb, weights, biases):
    B, T, N, C = x.shape
    H = weights[0].shape[-1] // 2
    n_win = T - 2
    BC = B * C

    # Wrapper-side layout plumbing: fold batch into the lane dim.
    x_t = jnp.transpose(x, (1, 2, 0, 3)).reshape(T, N, BC)   # (T, N, B*C), b-major lanes
    temb_t = jnp.tile(temb, (1, B))                          # (T, B*C)
    semb_t = jnp.tile(semb, (1, B))                          # (N, B*C)
    A_bf = A.astype(jnp.bfloat16)

    def x_spec(shift):
        def imap(i):
            return (i + shift, 0, 0)
        return pl.BlockSpec((None, N, BC), imap)             # one timestep per step

    def const2(shape):
        return pl.BlockSpec(shape, lambda i: (0, 0))

    def const3(shape):
        return pl.BlockSpec(shape, lambda i: (0, 0, 0))

    in_specs = [
        x_spec(0), x_spec(1), x_spec(2),       # the 3 timesteps of window i
        const2((3 * N, 3 * N)),                # A (resident)
        const2((T, BC)),                       # temporal emb (tiny, resident)
        const2((N, BC)),                       # spatial emb  (tiny, resident)
    ]
    args = [x_t, x_t, x_t, A_bf, temb_t, semb_t]
    for l in range(GCN_LAYERS):
        cin = weights[l].shape[1]
        in_specs.append(const3((n_win, cin, 2 * H)))   # all windows' W (tiny, resident)
        in_specs.append(const3((n_win, 1, 2 * H)))     # all windows' b
        args += [weights[l].astype(jnp.bfloat16), biases[l]]

    kernel = functools.partial(_stsgcl_kernel, B=B, N=N, H=H)

    out = pl.pallas_call(
        kernel,
        out_shape=jax.ShapeDtypeStruct((n_win, N, B * H), jnp.float32),
        grid=(n_win,),
        in_specs=in_specs,
        out_specs=pl.BlockSpec((None, N, B * H), lambda i: (i, 0, 0)),
        compiler_params=pltpu.CompilerParams(
            dimension_semantics=("parallel",),
            vmem_limit_bytes=32 * 1024 * 1024),
    )(*args)

    # (n_win, N, B*H) -> (B, n_win, N, H)
    return jnp.transpose(out.reshape(n_win, N, B, H), (2, 0, 1, 3))


def stsgcl_reference(x, A, temb, semb, weights, biases):
    """Pure-JAX f32 reference mirroring the PyTorch forward exactly."""
    B, T, N, C = x.shape
    H = weights[0].shape[-1] // 2
    xe = x + temb[None, :, None, :] + semb[None, None, :, :]
    outs = []
    for i in range(T - 2):
        t = xe[:, i:i + 3].reshape(B, 3 * N, C).transpose(1, 0, 2)   # (3N, B, C)
        h = t
        mids = []
        for l in range(GCN_LAYERS):
            g = jnp.einsum('nm,mbc->nbc', A, h)
            z = jnp.einsum('nbc,cd->nbd', g, weights[l][i]) + biases[l][i][None]
            h = z[..., :H] * jax.nn.sigmoid(z[..., H:])
            mids.append(h[N:2 * N])
        out = jnp.max(jnp.stack(mids, 0), axis=0)                    # (N, B, H)
        outs.append(jnp.transpose(out, (1, 0, 2)))                   # (B, N, H)
    return jnp.stack(outs, axis=1)                                   # (B, T-2, N, H)


if __name__ == "__main__":
    # Small shapes consistent with the module:
    B, T, N, C, H = 2, 8, 16, 4, 32          # batch, input_length, num_nodes, in_feat, nhid
    n_win = T - 2

    key = jax.random.PRNGKey(0)
    ks = jax.random.split(key, 4 + 2 * GCN_LAYERS)

    x = jax.random.normal(ks[0], (B, T, N, C), jnp.float32)
    A = jax.random.uniform(ks[1], (3 * N, 3 * N), jnp.float32, 0.0, 0.1)

    def xavier4(k, shape4, gain=3e-4):
        rec = shape4[2] * shape4[3]
        fan_in, fan_out = shape4[1] * rec, shape4[0] * rec
        std = gain * (2.0 / (fan_in + fan_out)) ** 0.5
        return std * jax.random.normal(k, shape4, jnp.float32)

    temb = xavier4(ks[2], (1, T, 1, C)).reshape(T, C)   # temporal_emb
    semb = xavier4(ks[3], (1, 1, N, C)).reshape(N, C)   # spatial_emb

    weights, biases = [], []
    for l in range(GCN_LAYERS):
        cin = C if l == 0 else H
        bound = 1.0 / (cin ** 0.5)
        W = jax.random.uniform(ks[4 + 2 * l], (n_win, cin, 2 * H), jnp.float32, -bound, bound)
        bv = jax.random.uniform(ks[5 + 2 * l], (n_win, 1, 2 * H), jnp.float32, -bound, bound)
        weights.append(W)
        biases.append(bv)

    out = stsgcl_forward(x, A, temb, semb, weights, biases)
    out = jax.block_until_ready(out)

    ref = stsgcl_reference(x, A, temb, semb, weights, biases)
    assert out.shape == (B, n_win, N, H), out.shape
    err = float(jnp.max(jnp.abs(out - ref)))
    # bf16 matmul operands with f32 accumulation: allow a small tolerance vs f32 ref.
    assert err < 2e-2, f"max abs err {err}"
    print("KERNEL_OK")
</pallas_src>

<mosaic_0001>
module attributes {stable_mosaic.version = 11 : i64} {
  func.func @_stsgcl_kernel(%arg0: i32, %arg1: memref<1x16x8xf32, #tpu.memory_space<vmem>>, %arg2: memref<1x16x8xf32, #tpu.memory_space<vmem>>, %arg3: memref<1x16x8xf32, #tpu.memory_space<vmem>>, %arg4: memref<48x48xbf16, #tpu.memory_space<vmem>>, %arg5: memref<8x8xf32, #tpu.memory_space<vmem>>, %arg6: memref<16x8xf32, #tpu.memory_space<vmem>>, %arg7: memref<6x4x64xbf16, #tpu.memory_space<vmem>>, %arg8: memref<6x1x64xf32, #tpu.memory_space<vmem>>, %arg9: memref<6x32x64xbf16, #tpu.memory_space<vmem>>, %arg10: memref<6x1x64xf32, #tpu.memory_space<vmem>>, %arg11: memref<6x32x64xbf16, #tpu.memory_space<vmem>>, %arg12: memref<6x1x64xf32, #tpu.memory_space<vmem>>, %arg13: memref<1x16x64xf32, #tpu.memory_space<vmem>>) attributes {dimension_semantics = [#tpu.dimension_semantics<parallel>], iteration_bounds = array<i64: 6>, scalar_prefetch = 0 : i64, scratch_operands = 0 : i64, tpu.core_type = #tpu.core_type<tc>, window_params = [{transform_indices = @transform_0, window_bounds = array<i64: 1, 16, 8>}, {transform_indices = @transform_1, window_bounds = array<i64: 1, 16, 8>}, {transform_indices = @transform_2, window_bounds = array<i64: 1, 16, 8>}, {pipeline_mode = #tpu.pipeline_mode<synchronous>, transform_indices = @transform_3, window_bounds = array<i64: 48, 48>}, {pipeline_mode = #tpu.pipeline_mode<synchronous>, transform_indices = @transform_4, window_bounds = array<i64: 8, 8>}, {pipeline_mode = #tpu.pipeline_mode<synchronous>, transform_indices = @transform_5, window_bounds = array<i64: 16, 8>}, {pipeline_mode = #tpu.pipeline_mode<synchronous>, transform_indices = @transform_6, window_bounds = array<i64: 6, 4, 64>}, {pipeline_mode = #tpu.pipeline_mode<synchronous>, transform_indices = @transform_7, window_bounds = array<i64: 6, 1, 64>}, {pipeline_mode = #tpu.pipeline_mode<synchronous>, transform_indices = @transform_8, window_bounds = array<i64: 6, 32, 64>}, {pipeline_mode = #tpu.pipeline_mode<synchronous>, transform_indices = @transform_9, window_bounds = array<i64: 6, 1, 64>}, {pipeline_mode = #tpu.pipeline_mode<synchronous>, transform_indices = @transform_10, window_bounds = array<i64: 6, 32, 64>}, {pipeline_mode = #tpu.pipeline_mode<synchronous>, transform_indices = @transform_11, window_bounds = array<i64: 6, 1, 64>}, {transform_indices = @transform_12, window_bounds = array<i64: 1, 16, 64>}]} {
    %c0 = arith.constant 0 : index
    %c0_0 = arith.constant 0 : index
    %0 = vector.load %arg4[%c0, %c0_0] : memref<48x48xbf16, #tpu.memory_space<vmem>>, vector<48x48xbf16>
    %c0_1 = arith.constant 0 : index
    %c0_2 = arith.constant 0 : index
    %1 = vector.load %arg6[%c0_1, %c0_2] : memref<16x8xf32, #tpu.memory_space<vmem>>, vector<16x8xf32>
    %c0_i32 = arith.constant 0 : i32
    %2 = arith.addi %arg0, %c0_i32 : i32
    %3 = arith.index_cast %2 : i32 to index
    %c0_3 = arith.constant 0 : index
    %4 = vector.load %arg5[%3, %c0_3] : memref<8x8xf32, #tpu.memory_space<vmem>>, vector<1x8xf32>
    %c0_4 = arith.constant 0 : index
    %c0_5 = arith.constant 0 : index
    %c0_6 = arith.constant 0 : index
    %5 = vector.load %arg1[%c0_4, %c0_5, %c0_6] : memref<1x16x8xf32, #tpu.memory_space<vmem>>, vector<1x16x8xf32>
    %6 = vector.shape_cast %5 : vector<1x16x8xf32> to vector<16x8xf32>
    %7 = vector.broadcast %4 : vector<1x8xf32> to vector<16x8xf32>
    %8 = arith.addf %6, %7 : vector<16x8xf32>
    %9 = arith.addf %8, %1 : vector<16x8xf32>
    %c1_i32 = arith.constant 1 : i32
    %10 = arith.addi %arg0, %c1_i32 : i32
    %11 = arith.index_cast %10 : i32 to index
    %c0_7 = arith.constant 0 : index
    %12 = vector.load %arg5[%11, %c0_7] : memref<8x8xf32, #tpu.memory_space<vmem>>, vector<1x8xf32>
    %c0_8 = arith.constant 0 : index
    %c0_9 = arith.constant 0 : index
    %c0_10 = arith.constant 0 : index
    %13 = vector.load %arg2[%c0_8, %c0_9, %c0_10] : memref<1x16x8xf32, #tpu.memory_space<vmem>>, vector<1x16x8xf32>
    %14 = vector.shape_cast %13 : vector<1x16x8xf32> to vector<16x8xf32>
    %15 = vector.broadcast %12 : vector<1x8xf32> to vector<16x8xf32>
    %16 = arith.addf %14, %15 : vector<16x8xf32>
    %17 = arith.addf %16, %1 : vector<16x8xf32>
    %c2_i32 = arith.constant 2 : i32
    %18 = arith.addi %arg0, %c2_i32 : i32
    %19 = arith.index_cast %18 : i32 to index
    %c0_11 = arith.constant 0 : index
    %20 = vector.load %arg5[%19, %c0_11] : memref<8x8xf32, #tpu.memory_space<vmem>>, vector<1x8xf32>
    %c0_12 = arith.constant 0 : index
    %c0_13 = arith.constant 0 : index
    %c0_14 = arith.constant 0 : index
    %21 = vector.load %arg3[%c0_12, %c0_13, %c0_14] : memref<1x16x8xf32, #tpu.memory_space<vmem>>, vector<1x16x8xf32>
    %22 = vector.shape_cast %21 : vector<1x16x8xf32> to vector<16x8xf32>
    %23 = vector.broadcast %20 : vector<1x8xf32> to vector<16x8xf32>
    %24 = arith.addf %22, %23 : vector<16x8xf32>
    %25 = arith.addf %24, %1 : vector<16x8xf32>
    %26 = tpu.concatenate %9, %17, %25 in 0 : vector<16x8xf32>, vector<16x8xf32>, vector<16x8xf32> -> vector<48x8xf32>
    %27 = arith.index_cast %arg0 : i32 to index
    %c0_15 = arith.constant 0 : index
    %c0_16 = arith.constant 0 : index
    %28 = vector.load %arg7[%27, %c0_15, %c0_16] : memref<6x4x64xbf16, #tpu.memory_space<vmem>>, vector<1x4x64xbf16>
    %29 = vector.shape_cast %28 : vector<1x4x64xbf16> to vector<4x64xbf16>
    %30 = arith.index_cast %arg0 : i32 to index
    %c0_17 = arith.constant 0 : index
    %c0_18 = arith.constant 0 : index
    %31 = vector.load %arg8[%30, %c0_17, %c0_18] : memref<6x1x64xf32, #tpu.memory_space<vmem>>, vector<1x1x64xf32>
    %32 = vector.shape_cast %31 : vector<1x1x64xf32> to vector<1x64xf32>
    %33 = arith.truncf %26 : vector<48x8xf32> to vector<48x8xbf16>
    %cst = arith.constant dense<0.000000e+00> : vector<48x8xf32>
    %34 = tpu.matmul %0, %33, %cst {dimension_numbers = #tpu.dot_dimension_numbers<[1], [0], [0], [1], [0, 0, 1, 1], [], []>} : vector<48x48xbf16>, vector<48x8xbf16>, vector<48x8xf32> -> vector<48x8xf32>
    %35 = vector.extract_strided_slice %34 {offsets = [0, 0], sizes = [48, 4], strides = [1, 1]} : vector<48x8xf32> to vector<48x4xf32>
    %36 = vector.extract_strided_slice %34 {offsets = [0, 4], sizes = [48, 4], strides = [1, 1]} : vector<48x8xf32> to vector<48x4xf32>
    %37 = tpu.concatenate %35, %36 in 0 : vector<48x4xf32>, vector<48x4xf32> -> vector<96x4xf32>
    %38 = arith.truncf %37 : vector<96x4xf32> to vector<96x4xbf16>
    %cst_19 = arith.constant dense<0.000000e+00> : vector<96x64xf32>
    %39 = tpu.matmul %38, %29, %cst_19 {dimension_numbers = #tpu.dot_dimension_numbers<[1], [0], [0], [1], [0, 0, 1, 1], [], []>} : vector<96x4xbf16>, vector<4x64xbf16>, vector<96x64xf32> -> vector<96x64xf32>
    %40 = vector.broadcast %32 : vector<1x64xf32> to vector<96x64xf32>
    %41 = arith.addf %39, %40 : vector<96x64xf32>
    %42 = vector.extract_strided_slice %41 {offsets = [0, 0], sizes = [96, 32], strides = [1, 1]} : vector<96x64xf32> to vector<96x32xf32>
    %43 = vector.extract_strided_slice %41 {offsets = [0, 32], sizes = [96, 32], strides = [1, 1]} : vector<96x64xf32> to vector<96x32xf32>
    %44 = arith.negf %43 : vector<96x32xf32>
    %45 = math.exp %44 : vector<96x32xf32>
    %cst_20 = arith.constant 1.000000e+00 : f32
    %46 = vector.broadcast %cst_20 : f32 to vector<96x32xf32>
    %47 = arith.addf %46, %45 : vector<96x32xf32>
    %48 = arith.divf %46, %47 : vector<96x32xf32>
    %49 = arith.mulf %42, %48 : vector<96x32xf32>
    %50 = vector.extract_strided_slice %49 {offsets = [0, 0], sizes = [48, 32], strides = [1, 1]} : vector<96x32xf32> to vector<48x32xf32>
    %51 = vector.extract_strided_slice %49 {offsets = [48, 0], sizes = [48, 32], strides = [1, 1]} : vector<96x32xf32> to vector<48x32xf32>
    %52 = tpu.concatenate %50, %51 in 1 : vector<48x32xf32>, vector<48x32xf32> -> vector<48x64xf32>
    %53 = vector.extract_strided_slice %52 {offsets = [16, 0], sizes = [16, 64], strides = [1, 1]} : vector<48x64xf32> to vector<16x64xf32>
    %54 = arith.index_cast %arg0 : i32 to index
    %c0_21 = arith.constant 0 : index
    %c0_22 = arith.constant 0 : index
    %55 = vector.load %arg9[%54, %c0_21, %c0_22] : memref<6x32x64xbf16, #tpu.memory_space<vmem>>, vector<1x32x64xbf16>
    %56 = vector.shape_cast %55 : vector<1x32x64xbf16> to vector<32x64xbf16>
    %57 = arith.index_cast %arg0 : i32 to index
    %c0_23 = arith.constant 0 : index
    %c0_24 = arith.constant 0 : index
    %58 = vector.load %arg10[%57, %c0_23, %c0_24] : memref<6x1x64xf32, #tpu.memory_space<vmem>>, vector<1x1x64xf32>
    %59 = vector.shape_cast %58 : vector<1x1x64xf32> to vector<1x64xf32>
    %60 = arith.truncf %52 : vector<48x64xf32> to vector<48x64xbf16>
    %cst_25 = arith.constant dense<0.000000e+00> : vector<48x64xf32>
    %61 = tpu.matmul %0, %60, %cst_25 {dimension_numbers = #tpu.dot_dimension_numbers<[1], [0], [0], [1], [0, 0, 1, 1], [], []>} : vector<48x48xbf16>, vector<48x64xbf16>, vector<48x64xf32> -> vector<48x64xf32>
    %62 = vector.extract_strided_slice %61 {offsets = [0, 0], sizes = [48, 32], strides = [1, 1]} : vector<48x64xf32> to vector<48x32xf32>
    %63 = vector.extract_strided_slice %61 {offsets = [0, 32], sizes = [48, 32], strides = [1, 1]} : vector<48x64xf32> to vector<48x32xf32>
    %64 = tpu.concatenate %62, %63 in 0 : vector<48x32xf32>, vector<48x32xf32> -> vector<96x32xf32>
    %65 = arith.truncf %64 : vector<96x32xf32> to vector<96x32xbf16>
    %cst_26 = arith.constant dense<0.000000e+00> : vector<96x64xf32>
    %66 = tpu.matmul %65, %56, %cst_26 {dimension_numbers = #tpu.dot_dimension_numbers<[1], [0], [0], [1], [0, 0, 1, 1], [], []>} : vector<96x32xbf16>, vector<32x64xbf16>, vector<96x64xf32> -> vector<96x64xf32>
    %67 = vector.broadcast %59 : vector<1x64xf32> to vector<96x64xf32>
    %68 = arith.addf %66, %67 : vector<96x64xf32>
    %69 = vector.extract_strided_slice %68 {offsets = [0, 0], sizes = [96, 32], strides = [1, 1]} : vector<96x64xf32> to vector<96x32xf32>
    %70 = vector.extract_strided_slice %68 {offsets = [0, 32], sizes = [96, 32], strides = [1, 1]} : vector<96x64xf32> to vector<96x32xf32>
    %71 = arith.negf %70 : vector<96x32xf32>
    %72 = math.exp %71 : vector<96x32xf32>
    %cst_27 = arith.constant 1.000000e+00 : f32
    %73 = vector.broadcast %cst_27 : f32 to vector<96x32xf32>
    %74 = arith.addf %73, %72 : vector<96x32xf32>
    %75 = arith.divf %73, %74 : vector<96x32xf32>
    %76 = arith.mulf %69, %75 : vector<96x32xf32>
    %77 = vector.extract_strided_slice %76 {offsets = [0, 0], sizes = [48, 32], strides = [1, 1]} : vector<96x32xf32> to vector<48x32xf32>
    %78 = vector.extract_strided_slice %76 {offsets = [48, 0], sizes = [48, 32], strides = [1, 1]} : vector<96x32xf32> to vector<48x32xf32>
    %79 = tpu.concatenate %77, %78 in 1 : vector<48x32xf32>, vector<48x32xf32> -> vector<48x64xf32>
    %80 = vector.extract_strided_slice %79 {offsets = [16, 0], sizes = [16, 64], strides = [1, 1]} : vector<48x64xf32> to vector<16x64xf32>
    %81 = arith.index_cast %arg0 : i32 to index
    %c0_28 = arith.constant 0 : index
    %c0_29 = arith.constant 0 : index
    %82 = vector.load %arg11[%81, %c0_28, %c0_29] : memref<6x32x64xbf16, #tpu.memory_space<vmem>>, vector<1x32x64xbf16>
    %83 = vector.shape_cast %82 : vector<1x32x64xbf16> to vector<32x64xbf16>
    %84 = arith.index_cast %arg0 : i32 to index
    %c0_30 = arith.constant 0 : index
    %c0_31 = arith.constant 0 : index
    %85 = vector.load %arg12[%84, %c0_30, %c0_31] : memref<6x1x64xf32, #tpu.memory_space<vmem>>, vector<1x1x64xf32>
    %86 = vector.shape_cast %85 : vector<1x1x64xf32> to vector<1x64xf32>
    %87 = arith.truncf %79 : vector<48x64xf32> to vector<48x64xbf16>
    %cst_32 = arith.constant dense<0.000000e+00> : vector<48x64xf32>
    %88 = tpu.matmul %0, %87, %cst_32 {dimension_numbers = #tpu.dot_dimension_numbers<[1], [0], [0], [1], [0, 0, 1, 1], [], []>} : vector<48x48xbf16>, vector<48x64xbf16>, vector<48x64xf32> -> vector<48x64xf32>
    %89 = vector.extract_strided_slice %88 {offsets = [0, 0], sizes = [48, 32], strides = [1, 1]} : vector<48x64xf32> to vector<48x32xf32>
    %90 = vector.extract_strided_slice %88 {offsets = [0, 32], sizes = [48, 32], strides = [1, 1]} : vector<48x64xf32> to vector<48x32xf32>
    %91 = tpu.concatenate %89, %90 in 0 : vector<48x32xf32>, vector<48x32xf32> -> vector<96x32xf32>
    %92 = arith.truncf %91 : vector<96x32xf32> to vector<96x32xbf16>
    %cst_33 = arith.constant dense<0.000000e+00> : vector<96x64xf32>
    %93 = tpu.matmul %92, %83, %cst_33 {dimension_numbers = #tpu.dot_dimension_numbers<[1], [0], [0], [1], [0, 0, 1, 1], [], []>} : vector<96x32xbf16>, vector<32x64xbf16>, vector<96x64xf32> -> vector<96x64xf32>
    %94 = vector.broadcast %86 : vector<1x64xf32> to vector<96x64xf32>
    %95 = arith.addf %93, %94 : vector<96x64xf32>
    %96 = vector.extract_strided_slice %95 {offsets = [0, 0], sizes = [96, 32], strides = [1, 1]} : vector<96x64xf32> to vector<96x32xf32>
    %97 = vector.extract_strided_slice %95 {offsets = [0, 32], sizes = [96, 32], strides = [1, 1]} : vector<96x64xf32> to vector<96x32xf32>
    %98 = arith.negf %97 : vector<96x32xf32>
    %99 = math.exp %98 : vector<96x32xf32>
    %cst_34 = arith.constant 1.000000e+00 : f32
    %100 = vector.broadcast %cst_34 : f32 to vector<96x32xf32>
    %101 = arith.addf %100, %99 : vector<96x32xf32>
    %102 = arith.divf %100, %101 : vector<96x32xf32>
    %103 = arith.mulf %96, %102 : vector<96x32xf32>
    %104 = vector.extract_strided_slice %103 {offsets = [0, 0], sizes = [48, 32], strides = [1, 1]} : vector<96x32xf32> to vector<48x32xf32>
    %105 = vector.extract_strided_slice %103 {offsets = [48, 0], sizes = [48, 32], strides = [1, 1]} : vector<96x32xf32> to vector<48x32xf32>
    %106 = tpu.concatenate %104, %105 in 1 : vector<48x32xf32>, vector<48x32xf32> -> vector<48x64xf32>
    %107 = vector.extract_strided_slice %106 {offsets = [16, 0], sizes = [16, 64], strides = [1, 1]} : vector<48x64xf32> to vector<16x64xf32>
    %108 = arith.maximumf %53, %80 : vector<16x64xf32>
    %109 = arith.maximumf %108, %107 : vector<16x64xf32>
    %c0_35 = arith.constant 0 : index
    %c0_36 = arith.constant 0 : index
    %c0_37 = arith.constant 0 : index
    %110 = vector.load %arg13[%c0_35, %c0_36, %c0_37] : memref<1x16x64xf32, #tpu.memory_space<vmem>>, vector<1x16x64xf32>
    %111 = vector.shape_cast %110 : vector<1x16x64xf32> to vector<16x64xf32>
    %112 = vector.shape_cast %109 : vector<16x64xf32> to vector<1x16x64xf32>
    tpu.vector_store %arg13[%c0_35, %c0_36, %c0_37], %112 {strides = array<i32>} : memref<1x16x64xf32, #tpu.memory_space<vmem>>, vector<1x16x64xf32>,
    return
  }
  func.func @transform_0(%arg0: i32) -> (i32, i32, i32) {
    %c0_i32 = arith.constant 0 : i32
    %0 = arith.addi %arg0, %c0_i32 : i32
    %c0_i32_0 = arith.constant 0 : i32
    %c0_i32_1 = arith.constant 0 : i32
    %c0_i32_2 = arith.constant 0 : i32
    return %0, %c0_i32_0, %c0_i32_1 : i32, i32, i32
  }
  func.func @transform_1(%arg0: i32) -> (i32, i32, i32) {
    %c1_i32 = arith.constant 1 : i32
    %0 = arith.addi %arg0, %c1_i32 : i32
    %c0_i32 = arith.constant 0 : i32
    %c0_i32_0 = arith.constant 0 : i32
    %c0_i32_1 = arith.constant 0 : i32
    return %0, %c0_i32, %c0_i32_0 : i32, i32, i32
  }
  func.func @transform_2(%arg0: i32) -> (i32, i32, i32) {
    %c2_i32 = arith.constant 2 : i32
    %0 = arith.addi %arg0, %c2_i32 : i32
    %c0_i32 = arith.constant 0 : i32
    %c0_i32_0 = arith.constant 0 : i32
    %c0_i32_1 = arith.constant 0 : i32
    return %0, %c0_i32, %c0_i32_0 : i32, i32, i32
  }
  func.func @transform_3(%arg0: i32) -> (i32, i32) {
    %c0_i32 = arith.constant 0 : i32
    %c0_i32_0 = arith.constant 0 : i32
    %c0_i32_1 = arith.constant 0 : i32
    return %c0_i32, %c0_i32_0 : i32, i32
  }
  func.func @transform_4(%arg0: i32) -> (i32, i32) {
    %c0_i32 = arith.constant 0 : i32
    %c0_i32_0 = arith.constant 0 : i32
    %c0_i32_1 = arith.constant 0 : i32
    return %c0_i32, %c0_i32_0 : i32, i32
  }
  func.func @transform_5(%arg0: i32) -> (i32, i32) {
    %c0_i32 = arith.constant 0 : i32
    %c0_i32_0 = arith.constant 0 : i32
    %c0_i32_1 = arith.constant 0 : i32
    return %c0_i32, %c0_i32_0 : i32, i32
  }
  func.func @transform_6(%arg0: i32) -> (i32, i32, i32) {
    %c0_i32 = arith.constant 0 : i32
    %c0_i32_0 = arith.constant 0 : i32
    %c0_i32_1 = arith.constant 0 : i32
    %c0_i32_2 = arith.constant 0 : i32
    return %c0_i32, %c0_i32_0, %c0_i32_1 : i32, i32, i32
  }
  func.func @transform_7(%arg0: i32) -> (i32, i32, i32) {
    %c0_i32 = arith.constant 0 : i32
    %c0_i32_0 = arith.constant 0 : i32
    %c0_i32_1 = arith.constant 0 : i32
    %c0_i32_2 = arith.constant 0 : i32
    return %c0_i32, %c0_i32_0, %c0_i32_1 : i32, i32, i32
  }
  func.func @transform_8(%arg0: i32) -> (i32, i32, i32) {
    %c0_i32 = arith.constant 0 : i32
    %c0_i32_0 = arith.constant 0 : i32
    %c0_i32_1 = arith.constant 0 : i32
    %c0_i32_2 = arith.constant 0 : i32
    return %c0_i32, %c0_i32_0, %c0_i32_1 : i32, i32, i32
  }
  func.func @transform_9(%arg0: i32) -> (i32, i32, i32) {
    %c0_i32 = arith.constant 0 : i32
    %c0_i32_0 = arith.constant 0 : i32
    %c0_i32_1 = arith.constant 0 : i32
    %c0_i32_2 = arith.constant 0 : i32
    return %c0_i32, %c0_i32_0, %c0_i32_1 : i32, i32, i32
  }
  func.func @transform_10(%arg0: i32) -> (i32, i32, i32) {
    %c0_i32 = arith.constant 0 : i32
    %c0_i32_0 = arith.constant 0 : i32
    %c0_i32_1 = arith.constant 0 : i32
    %c0_i32_2 = arith.constant 0 : i32
    return %c0_i32, %c0_i32_0, %c0_i32_1 : i32, i32, i32
  }
  func.func @transform_11(%arg0: i32) -> (i32, i32, i32) {
    %c0_i32 = arith.constant 0 : i32
    %c0_i32_0 = arith.constant 0 : i32
    %c0_i32_1 = arith.constant 0 : i32
    %c0_i32_2 = arith.constant 0 : i32
    return %c0_i32, %c0_i32_0, %c0_i32_1 : i32, i32, i32
  }
  func.func @transform_12(%arg0: i32) -> (i32, i32, i32) {
    %c0_i32 = arith.constant 0 : i32
    %c0_i32_0 = arith.constant 0 : i32
    %c0_i32_1 = arith.constant 0 : i32
    return %arg0, %c0_i32, %c0_i32_0 : i32, i32, i32
  }
}

</mosaic_0001>

<bundles_post_ra>
// kernel: tpu_custom_call.1
= control target key start
LH: loop header
LB: loop body
LE: loop exit
PB: predicated region body
PF: predicated region fallthrough
CT: control target
= control target key end

     0   :  { %s2697_s0 = inlined_call_operand.vmem [shape: f32[8,16,8], index: 0, kind: input, shape index: {}]   ;;  %s2698_s1 = inlined_call_operand.vmem [shape: f32[8,16,8], index: 1, kind: input, shape index: {}]   ;;  %s2699_s2 = inlined_call_operand.vmem [shape: f32[8,16,8], index: 2, kind: input, shape index: {}]   ;;  %s2700_s3 = inlined_call_operand.vmem [shape: bf16[48,48], index: 3, kind: input, shape index: {}]   ;;  %s2701_s4 = inlined_call_operand.vmem [shape: f32[8,8], index: 4, kind: input, shape index: {}]   ;;  %s2702_s5 = inlined_call_operand.vmem [shape: f32[16,8], index: 5, kind: input, shape index: {}]   ;;  %s2703_s6 = inlined_call_operand.vmem [shape: bf16[6,4,64], index: 6, kind: input, shape index: {}]   ;;  %s2704_s7 = inlined_call_operand.vmem [shape: f32[6,1,64], index: 7, kind: input, shape index: {}]   ;;  %s2705_s8 = inlined_call_operand.vmem [shape: bf16[6,32,64], index: 8, kind: input, shape index: {}]   ;;  %s2706_s9 = inlined_call_operand.vmem [shape: f32[6,1,64], index: 9, kind: input, shape index: {}]   ;;  %s2707_s10 = inlined_call_operand.vmem [shape: bf16[6,32,64], index: 10, kind: input, shape index: {}]   ;;  %s2708_s11 = inlined_call_operand.vmem [shape: f32[6,1,64], index: 11, kind: input, shape index: {}]   ;;  %s2709_s12 = inlined_call_operand.hbm [shape: f32[6,16,64], index: 12, kind: output, shape index: {}]  }
   0x1   :  { %2714 = sst [smem:[#allocation9_spill]] %s2701_s4 }
   0x2   :  { %17 = vsyncpa [#allocation3], 0 }
   0x3   :  { %19 = vsyncpa [#allocation3 + $0x1], 0  ;;  %s2269_s21 = smov 0   ;;  %s2271_s22 = smov 0  }
   0x4   :  { %s2273_s23 = smov 0   ;;  %s2275_s24 = smov 0  }
   0x5 LB: > { %2715 = sst [smem:[#allocation5_spill]] %s2190_s23  ;;  %s2290_s25 = sadd.s32 4294967295, %s2194_s24   ;;  %s2194_s24 = sphi %s2275_s24, %s2723_s24   ;;  %s2190_s23 = sphi %s2273_s23, %s2725_s23   ;;  %s2186_s22 = sphi %s2271_s22, %s2727_s22   ;;  %s2182_s21 = sphi %s2269_s21, %s2726_s21  }
   0x6   : > { %s1666_s26 = sadd.s32 4294967294, %s2194_s24   ;;  %s2294_s27 = sadd.s32 1, %s2194_s24  }
   0x7   : > { %2716 = sst [smem:[#allocation6_spill]] %s2294_s27  ;;  %s303_s28 = sadd.s32 1, %s2190_s23 }
   0x8   : > { %s300_s29 = ssub.s32 %s2194_s24, %s2294_s27  ;;  %p313_p0 = scmp.ne.s32.totalorder %s2190_s23, %s2186_s22 }
   0x9   : > { %p301_p1 = scmp.eq.s32.totalorder %s300_s29, 0  ;;  %p314_p2 = scmp.eq.s32.totalorder %s2290_s25, 5 }
   0xa   : > { %p319_p3 = scmp.ne.s32.totalorder %s2186_s22, %s2182_s21  ;;  %p320_p4 = scmp.eq.s32.totalorder %s1666_s26, 5 }
   0xb   : > { %s2305_s30 = scalar_select %p301_p1, %s2190_s23, %s303_s28  }
   0xc   : > { %p2307_p5 = por %p314_p2, %p313_p0  ;;  %p2311_p6 = por %p320_p4, %p319_p3 }
   0xd   : > { %2717 = sst [smem:[#allocation7_spill]] %s2305_s30  ;;  %p1669_p7 = scmp.ge.s32.totalorder %s2194_s24, 1 }
   0xe   : > { %s2719_s14 = scalar_select %p2311_p6, 1, 0 }
   0xf   : > { %p393_p8 = scmp.lt.s32.totalorder %s2194_s24, 7 }
  0x10   : > { %2720 = sst [smem:[#allocation8_spill]] %s2719_s14 }
  0x11   : > { %p394_p9 = pnand %p1669_p7, %p393_p8 }
  0x12   : > { %s459_s15 = sadd.s32 (!%p394_p9), 2, %s2290_s25  ;;  %s2721_s4 = sld [smem:[#allocation9_spill]] (!%p394_p9) }
  0x13   : > { %397 = sbr.rel (%p394_p9) target bundleno = 2491 (0x9bb), region = 68  ;;  %p460_p10 = scmp.lt.s32.totalorder (!%p394_p9), %s459_s15, 7 }
  0x14   : > { %s452_s19 = sadd.s32 (!%p394_p9), 1, %s2290_s25  ;;  %p447_p12 = scmp.lt.s32.totalorder (!%p394_p9), %s2290_s25, 7 }
  0x15   : > { %p453_p11 = scmp.lt.s32.totalorder (!%p394_p9), %s452_s19, 7  ;;  %s1682_s16 = sshll.u32 (!%p394_p9), %s2290_s25, 1 }
  0x16   : > { %s2200_s27 = smov (!%p394_p9), 32  }
  0x18   : > { %s2322_s18 = scalar_lea.vmem %s2721_s4, %s2290_s25  ;;  %v2196_v0 = vmov 0.0   ;;  %vm2197_vm0 = vmmov 0   ;;  %s2729_s15 = smov (!%p460_p10, %s459_s15), 7  ;;  %v473_v2 = vld [vmem:[%s2702_s5] sm:$0xff]  ;;  %v474_v4 = vld [vmem:[%s2702_s5 + $0x8] sm:$0xff]  ;;  %vm536_vm1 = vcmask 392192  }
  0x19   : > { %1803 = vmatprep.subr.bf16.mxu0 %v2196_v0  ;;  %1809 = vmatprep.mubr.msk.bf16.mxu0 %vm2197_vm0, %v2196_v0  ;;  %s2731_s19 = smov (!%p453_p11, %s452_s19), 7  ;;  %s1758_s20 = sshll.u32 %s2729_s15, 4  ;;  %v1681_v1 = vld [vmem:[%s2322_s18 + $0x2] ss:$0 sm:$0xff]  ;;  %v1679_v3 = vld [vmem:[%s2322_s18 + $0x1] ss:$0 sm:$0xff] }
  0x1a   : > { %s464_s29 = scalar_lea.vmem %s2699_s2, %s1758_s20  ;;  %s1757_s4 = sshll.u32 %s2731_s19, 4  ;;  %v1677_v15 = vld [vmem:[%s2322_s18] ss:$0 sm:$0xff]  ;;  %v2364_v28 = vld [vmem:[%s2700_s3 + $0x8] sm:$0xff]   ;;  %v2373_v29 = vld [vmem:[%s2700_s3 + $0x10] sm:$0xff]   ;;  %vm658_vm2 = vcmask 1041408  }
  0x1b   : > { %v503_v5 = vld [vmem:[%s464_s29] sm:$0xff]  ;;  %v504_v6 = vld [vmem:[%s464_s29 + $0x8] sm:$0xff]  ;;  %s457_s14 = scalar_lea.vmem %s2698_s1, %s1757_s4  ;;  %vm639_vm3 = vcmask 31744   ;;  %s2199_s4 = smov 96   ;;  %vm899_vm4 = vcmask 261120   ;;  %vm1549_vm5 = vcmask 523264  }
  0x1c   : > { %v509_v7 = vadd.f32 %v1681_v1, %v503_v5  ;;  %v510_v8 = vadd.f32 %v1681_v1, %v504_v6  ;;  %v490_v9 = vld [vmem:[%s457_s14] sm:$0xff]  ;;  %v491_v10 = vld [vmem:[%s457_s14 + $0x8] sm:$0xff]  ;;  %s448_s20 = scalar_select %p447_p12, %s2290_s25, 7 }
  0x1d   : > { %v496_v11 = vadd.f32 %v1679_v3, %v490_v9  ;;  %v497_v12 = vadd.f32 %v1679_v3, %v491_v10  ;;  %v2355_v27 = vld [vmem:[%s2700_s3] sm:$0xff]   ;;  %s1759_s14 = sshll.u32 %s2290_s25, 4  ;;  %s913_s15 = scalar_lea.vmem %s2706_s9, %s2290_s25 }
  0x1e   : > { %v511_v13 = vadd.f32 %v509_v7, %v473_v2  ;;  %v512_v14 = vadd.f32 %v510_v8, %v474_v4  ;;  %s1756_s19 = sshll.u32 %s448_s20, 4  ;;  %s514_s20 = scalar_lea.vmem %s2703_s6, %s1682_s16 }
  0x1f   : > { %v498_v16 = vadd.f32 %v496_v11, %v473_v2  ;;  %v499_v17 = vadd.f32 %v497_v12, %v474_v4  ;;  %s451_s26 = scalar_lea.vmem %s2697_s0, %s1756_s19  ;;  %v515_v30 = vld [vmem:[%s514_s20] sm:$0x3]  ;;  %s2198_s19 = smov 124  }
  0x20   : > { %v520_v18 = vpack.c.bf16 %v512_v14, %v511_v13  ;;  %v477_v19 = vld [vmem:[%s451_s26] sm:$0xff]  ;;  %v478_v20 = vld [vmem:[%s451_s26 + $0x8] sm:$0xff]  ;;  %1903 = vmatprep.subr.msk.bf16.mxu1 %vm658_vm2, %v515_v30  ;;  %v660_v31 = vsel %vm658_vm2, %v515_v30, 0  ;;  %s516_s26 = scalar_lea.vmem %s2704_s7, %s2290_s25  ;;  %s908_s29 = scalar_lea.vmem %s2705_s8, %s1759_s14 }
  0x21   : > { %v483_v21 = vadd.f32 %v1677_v15, %v477_v19  ;;  %v484_v22 = vadd.f32 %v1677_v15, %v478_v20  ;;  %v519_v23 = vpack.c.bf16 %v499_v17, %v498_v16  ;;  %1822 = vmatpush3.bf16.msra.mxu1 %v660_v31  ;;  %v2396_v7 = vld [vmem:[%s516_s26] ss:$0 sm:$0xff]  ;;  %s1285_s23 = scalar_lea.vmem %s2707_s10, %s1759_s14  ;;  %s1290_s14 = scalar_lea.vmem %s2708_s11, %s2290_s25 }
  0x22   : > { %1804 = vmatpush3.bf16.msra.mxu0 %v520_v18  ;;  %1835 = vmatprep.subr.bf16.mxu1 %v2196_v0  ;;  %s444_s18 = sand.u32 1, %s2186_s22   ;;  %s1761_s16 = sshll.u32 %s2290_s25, 8 }
  0x23   : > { %1805 = vmatprep.subr.bf16.mxu0 %v2196_v0  ;;  %v485_v24 = vadd.f32 %v483_v21, %v473_v2  ;;  %v486_v25 = vadd.f32 %v484_v22, %v474_v4  ;;  %s1670_s28 = sshll.u32 %s444_s18, 4  ;;  %s2657_s25 = scalar_lea.sflag [#allocation3], %s444_s18 }
  0x25   : > { %v518_v26 = vpack.c.bf16 %v486_v25, %v485_v24 }
  0x26   : > { %1806 = vmatpush3.bf16.msra.mxu0 %v519_v23 }
  0x27   : > { %1807 = vmatprep.subr.bf16.mxu0 %v2196_v0 }
  0x2a   : > { %1808 = vmatpush3.bf16.msra.mxu0 %v518_v26 }
  0x2d   : > { %1810 = vmatmul.mubr.msk.bf16.vlgmr.msra.gmra.mxu0 %vm536_vm1, %v2355_v27 }
  0x2e   : > { %1813 = vmatprep.mubr.msk.bf16.mxu0 %vm2197_vm0, %v2196_v0 }
  0x35   : > { %1814 = vmatmul.mubr.msk.bf16.gmra.mxu0 %vm536_vm1, %v2364_v28 }
  0x36   : > { %1817 = vmatprep.mubr.msk.bf16.mxu0 %vm2197_vm0, %v2196_v0 }
  0x3d   : > { %1818 = vmatmul.mubr.msk.bf16.gmra.mxu0 %vm536_vm1, %v2373_v29 }
  0xed   : > { %v580_v32 = vpop.f32.mrf.mxu0 }
  0xef   : > { %v1811_v33 = vpop.f32.mrf.mxu0 }
  0xf1   : > { %v583_v34 = vpop.f32.mrf.mxu0 }
  0xf2   : > { %v1950_v35 = vpack.i.bf16 %v583_v34, %v580_v32  ;;  %v627_v36 = vpack.c.bf16 %v583_v34, %v580_v32 }
  0xf3   : > { %v1812_v37 = vpop.f32.mrf.mxu0 }
  0xf4   : > { %1951 = vrot.lane.b32.xlu0 %v1950_v35, %s2198_s19  ;;  %1823 = vmatprep.mubr.msk.bf16.mxu1 %vm639_vm3, %v627_v36 }
  0xf5   : > { %v588_v38 = vpop.f32.mrf.mxu0 }
  0xf7   : > { %v1815_v39 = vpop.f32.mrf.mxu0 }
  0xf9   : > { %v591_v40 = vpop.f32.mrf.mxu0 }
  0xfa   : > { %v1955_v41 = vpack.i.bf16 %v591_v40, %v588_v38  ;;  %v628_v42 = vpack.c.bf16 %v591_v40, %v588_v38 }
  0xfb   : > { %v1816_v43 = vpop.f32.mrf.mxu0 }
  0xfc   : > { %1956 = vrot.lane.b32.xlu0 %v1955_v41, %s2198_s19  ;;  %1824 = vmatmul.mubr.msk.bf16.vlgmr.msra.gmra.mxu1 %vm639_vm3, %v628_v42 }
  0xfd   : > { %v596_v44 = vpop.f32.mrf.mxu0 }
  0xff   : > { %v1819_v45 = vpop.f32.mrf.mxu0 }
 0x101   : > { %v599_v46 = vpop.f32.mrf.mxu0 }
 0x102   : > { %v629_v47 = vpack.c.bf16 %v599_v46, %v596_v44  ;;  %v1960_v48 = vpack.i.bf16 %v599_v46, %v596_v44 }
 0x103   : > { %v1820_v49 = vpop.f32.mrf.mxu0 }
 0x104   : > { %1961 = vrot.lane.b32.xlu1 %v1960_v48, %s2198_s19  ;;  %1827 = vmatprep.mubr.msk.bf16.mxu1 %vm639_vm3, %v629_v47  ;;  %s2201_s19 = smov [#allocation2]  }
 0x166   : > { %v1952_v50 = vpop.permute.xlu0 %1951 }
 0x167   : > { %v1954_v51 = vunpack.i.h.bf16 %v1952_v50  ;;  %v1953_v52 = vunpack.i.l.bf16 %v1952_v50 }
 0x169   : > { %v630_v53 = vpack.c.bf16 %v1954_v51, %v1953_v52 }
 0x16b   : > { %1828 = vmatmul.mubr.msk.bf16.gmra.mxu1 %vm639_vm3, %v630_v53 }
 0x16e   : > { %v1957_v54 = vpop.permute.xlu0 %1956 }
 0x16f   : > { %v1959_v55 = vunpack.i.h.bf16 %v1957_v54  ;;  %v1958_v56 = vunpack.i.l.bf16 %v1957_v54 }
 0x171   : > { %v631_v57 = vpack.c.bf16 %v1959_v55, %v1958_v56 }
 0x173   : > { %1831 = vmatprep.mubr.msk.bf16.mxu1 %vm639_vm3, %v631_v57 }
 0x176   : > { %v1962_v58 = vpop.permute.xlu1 %1961 }
 0x177   : > { %v1964_v59 = vunpack.i.h.bf16 %v1962_v58  ;;  %v1963_v60 = vunpack.i.l.bf16 %v1962_v58 }
 0x179   : > { %v632_v61 = vpack.c.bf16 %v1964_v59, %v1963_v60 }
 0x17b   : > { %1832 = vmatmul.mubr.msk.bf16.gmra.mxu1 %vm639_vm3, %v632_v61 }
 0x17c   : > { %1841 = vmatprep.mubr.msk.bf16.mxu1 %vm2197_vm0, %v2196_v0 }
 0x1bc   : > { %v1825_v62 = vpop.f32.mrf.mxu1 }
 0x1bd   : > { %v2433_v31 = vadd.f32 %v1825_v62, %v2396_v7 }
 0x1be   : > { %v696_v63 = vpop.f32.mrf.mxu1 }
 0x1bf   : > { %v2438_v34 = vadd.f32 %v2396_v7, %v696_v63  ;;  %v1698_v35 = vmul.f32 -1.442695, %v2433_v31 }
 0x1c0   : > { %v1826_v1 = vpop.f32.mrf.mxu1 }
 0x1c1   : > { %v2424_v23 = vadd.f32 %v1826_v1, %v2396_v7  ;;  %v1696_v37 = vmul.f32 -1.442695, %v2438_v34 }
 0x1c2   : > { %v2390_v2 = vpop.f32.mrf.mxu1 }
 0x1c3   : > { %v1699_v32 = vmul.f32 -1.442695, %v2424_v23 }
 0x22b   : > { %v1829_v3 = vpop.f32.mrf.mxu1 }
 0x22c   : > { %v2399_v9 = vadd.f32 %v1829_v3, %v2396_v7 }
 0x22d   : > { %v712_v4 = vpop.f32.mrf.mxu1 }
 0x22e   : > { %v1702_v15 = vmul.f32 -1.442695, %v2399_v9  ;;  %v2410_v16 = vadd.f32 %v2396_v7, %v712_v4 }
 0x22f   : > { %v1830_v5 = vpop.f32.mrf.mxu1 }
 0x230   : > { %v2417_v19 = vadd.f32 %v1830_v5, %v2396_v7  ;;  %v1700_v24 = vmul.f32 -1.442695, %v2410_v16 }
 0x231   : > { %v715_v6 = vpop.f32.mrf.mxu1 }
 0x232   : > { %v1703_v26 = vmul.f32 -1.442695, %v2417_v19  ;;  %v2430_v30 = vadd.f32 %v2396_v7, %v715_v6 }
 0x234   : > { %v1701_v33 = vmul.f32 -1.442695, %v2430_v30 }
 0x23b   : > { %v1833_v8 = vpop.f32.mrf.mxu1 }
 0x23c   : > { %v2402_v10 = vadd.f32 %v1833_v8, %v2396_v7 }
 0x23d   : > { %v728_v11 = vpop.f32.mrf.mxu1 }
 0x23e   : > { %v1706_v12 = vmul.f32 -1.442695, %v2402_v10  ;;  %v2406_v13 = vadd.f32 %v2396_v7, %v728_v11  ;;  %v700_v11 = vadd.f32 %v2396_v7, %v2390_v2 }
 0x23f   : > { %v1834_v14 = vpop.f32.mrf.mxu1 }
 0x240   : > { %v1704_v17 = vmul.f32 -1.442695, %v2406_v13  ;;  %v2414_v18 = vadd.f32 %v1834_v14, %v2396_v7  ;;  %2022 = vpow2.f32 %v1706_v12  ;;  %v1697_v12 = vmul.f32 -1.442695, %v700_v11 }
 0x241   : > { %v731_v20 = vpop.f32.mrf.mxu1 }
 0x242   : > { %v1707_v21 = vmul.f32 -1.442695, %v2414_v18  ;;  %v2421_v22 = vadd.f32 %v2396_v7, %v731_v20  ;;  %2024 = vpow2.f32 %v1704_v17 }
 0x243   : > { %2026 = vpow2.f32 %v1702_v15 }
 0x244   : > { %v1705_v25 = vmul.f32 -1.442695, %v2421_v22  ;;  %2028 = vpow2.f32 %v1707_v21 }
 0x246   : > { %2030 = vpow2.f32 %v1705_v25 }
 0x247   : > { %2032 = vpow2.f32 %v1700_v24 }
 0x248   : > { %2034 = vpow2.f32 %v1703_v26 }
 0x249   : > { %2036 = vpow2.f32 %v1699_v32 }
 0x24a   : > { %2038 = vpow2.f32 %v1701_v33 }
 0x24b   : > { %2040 = vpow2.f32 %v1698_v35 }
 0x24d   : > { %v2023_v36 = vpop.eup %2022 }
 0x24e   : > { %v789_v38 = vadd.f32 1.0, %v2023_v36 }
 0x24f   : > { %v2025_v39 = vpop.eup %2024 }
 0x250   : > { %v2027_v40 = vpop.eup %2026  ;;  %2042 = vrcp.f32 %v789_v38  ;;  %v787_v41 = vadd.f32 1.0, %v2025_v39 }
 0x251   : > { %v2029_v42 = vpop.eup %2028  ;;  %2044 = vpow2.f32 %v1696_v37  ;;  %v785_v45 = vadd.f32 1.0, %v2027_v40 }
 0x252   : > { %v790_v43 = vadd.f32 1.0, %v2029_v42  ;;  %2046 = vrcp.f32 %v787_v41 }
 0x253   : > { %v2031_v44 = vpop.eup %2030 }
 0x254   : > { %v2033_v46 = vpop.eup %2032  ;;  %2048 = vrcp.f32 %v790_v43  ;;  %v788_v47 = vadd.f32 1.0, %v2031_v44 }
 0x255   : > { %v2035_v48 = vpop.eup %2034  ;;  %2050 = vrcp.f32 %v785_v45  ;;  %v783_v49 = vadd.f32 1.0, %v2033_v46 }
 0x256   : > { %v2037_v50 = vpop.eup %2036  ;;  %v786_v51 = vadd.f32 1.0, %v2035_v48  ;;  %2052 = vrcp.f32 %v788_v47 }
 0x257   : > { %v2039_v52 = vpop.eup %2038  ;;  %v782_v53 = vadd.f32 1.0, %v2037_v50  ;;  %2054 = vrcp.f32 %v783_v49 }
 0x258   : > { %v2041_v54 = vpop.eup %2040  ;;  %2056 = vrcp.f32 %v786_v51  ;;  %v784_v55 = vadd.f32 1.0, %v2039_v52 }
 0x259   : > { %2058 = vrcp.f32 %v782_v53  ;;  %v781_v59 = vadd.f32 1.0, %v2041_v54 }
 0x25a   : > { %2060 = vrcp.f32 %v784_v55 }
 0x25b   : > { %2062 = vrcp.f32 %v781_v59  ;;  %v2019_v59 = vld [vmem:[%s908_s29] sm:$0xff]  }
 0x25d   : > { %v2043_v56 = vpop.eup %2042 }
 0x25e   : > { %847 = vrot.lane.b32.xlu1 %v2043_v56, %s2199_s4  ;;  %v2045_v57 = vpop.eup %2044 }
 0x25f   : > { %v2047_v58 = vpop.eup %2046  ;;  %v779_v62 = vadd.f32 1.0, %v2045_v57 }
 0x261   : > { %v2049_v60 = vpop.eup %2048  ;;  %2064 = vrcp.f32 %v779_v62 }
 0x262   : > { %849 = vrot.lane.b32.xlu0 %v2049_v60, %s2199_s4  ;;  %843 = vrot.lane.b32.xlu1 %v2047_v58, %s2199_s4  ;;  %v2051_v61 = vpop.eup %2050  ;;  %2066 = vpow2.f32 %v1697_v12 }
 0x263   : > { %v2053_v63 = vpop.eup %2052 }
 0x264   : > { %v2055_v1 = vpop.eup %2054 }
 0x265   : > { %v2057_v3 = vpop.eup %2056 }
 0x266   : > { %845 = vrot.lane.b32.xlu0 %v2053_v63, %s2199_s4  ;;  %839 = vrot.lane.b32.xlu1 %v2051_v61, %s2199_s4  ;;  %v2059_v4 = vpop.eup %2058 }
 0x267   : > { %v2061_v5 = vpop.eup %2060 }
 0x268   : > { %v2063_v6 = vpop.eup %2062 }
 0x26a   : > { %841 = vrot.lane.b32.xlu0 %v2057_v3, %s2199_s4  ;;  %835 = vrot.lane.b32.xlu1 %v2055_v1, %s2199_s4 }
 0x26e   : > { %837 = vrot.lane.b32.xlu0 %v2061_v5, %s2199_s4  ;;  %833 = vrot.lane.b32.xlu1 %v2059_v4, %s2199_s4  ;;  %v2065_v8 = vpop.eup %2064 }
 0x26f   : > { %v2067_v14 = vpop.eup %2066 }
 0x270   : > { %v780_v15 = vadd.f32 1.0, %v2067_v14 }
 0x272   : > { %831 = vrot.lane.b32.xlu0 %v2063_v6, %s2199_s4  ;;  %2068 = vrcp.f32 %v780_v15 }
 0x276   : > { %827 = vrot.lane.b32.xlu0 %v2065_v8, %s2199_s4 }
 0x2d0   : > { %v848_v17 = vpop.permute.xlu1 %847 }
 0x2d1   : > { %v873_v24 = vmul.f32 %v848_v17, %v2402_v10 }
 0x2d4   : > { %v850_v20 = vpop.permute.xlu0 %849  ;;  %v844_v21 = vpop.permute.xlu1 %843 }
 0x2d5   : > { %v874_v25 = vmul.f32 %v850_v20, %v2414_v18  ;;  %v871_v26 = vmul.f32 %v844_v21, %v2406_v13  ;;  %v2069_v18 = vpop.eup %2068 }
 0x2d7   : > { %v1965_v32 = vpack.i.bf16 %v874_v25, %v873_v24  ;;  %885 = vrot.lane.b32.xlu0 %v871_v26, %s2200_s27 }
 0x2d8   : > { %v846_v33 = vpop.permute.xlu0 %845  ;;  %v840_v2 = vpop.permute.xlu1 %839 }
 0x2d9   : > { %1966 = vrot.lane.b32.xlu1 %v1965_v32, %s2200_s27  ;;  %v872_v7 = vmul.f32 %v846_v33, %v2421_v22  ;;  %v869_v36 = vmul.f32 %v840_v2, %v2399_v9 }
 0x2dc   : > { %v842_v35 = vpop.permute.xlu0 %841  ;;  %v836_v38 = vpop.permute.xlu1 %835 }
 0x2dd   : > { %v870_v37 = vmul.f32 %v842_v35, %v2417_v19  ;;  %887 = vrot.lane.b32.xlu1 %v872_v7, %s2200_s27  ;;  %v867_v22 = vmul.f32 %v836_v38, %v2410_v16 }
 0x2df   : > { %v1970_v10 = vpack.i.bf16 %v870_v37, %v869_v36 }
 0x2e0   : > { %v838_v13 = vpop.permute.xlu0 %837  ;;  %v834_v40 = vpop.permute.xlu1 %833 }
 0x2e1   : > { %1971 = vrot.lane.b32.xlu0 %v1970_v10, %s2200_s27  ;;  %829 = vrot.lane.b32.xlu1 %v2069_v18, %s2199_s4  ;;  %v868_v9 = vmul.f32 %v838_v13, %v2430_v30  ;;  %v866_v44 = vmul.f32 %v834_v40, %v2424_v23 }
 0x2e4   : > { %v832_v39 = vpop.permute.xlu0 %831 }
 0x2e5   : > { %v865_v50 = vmul.f32 %v832_v39, %v2433_v31 }
 0x2e8   : > { %v828_v41 = vpop.permute.xlu0 %827 }
 0x2e9   : > { %v863_v53 = vmul.f32 %v828_v41, %v2438_v34  ;;  %v2018_v34 = vld [vmem:[%s908_s29 + $0x8] sm:$0xff]  }
 0x2ea   : > { %1853 = vmatprep.subr.bf16.mxu0 %v2018_v34 }
 0x2eb   : > { %1854 = vmatpush3.bf16.msra.mxu0 %v2018_v34 }
 0x2ec   : > { %1855 = vmatprep.subr.bf16.mxu0 %v2019_v59 }
 0x2ef   : > { %1856 = vmatpush3.bf16.msra.mxu0 %v2019_v59 }
 0x349   : > { %v886_v47 = vpop.permute.xlu0 %885 }
 0x34a   : > { %v2476_v16 = vsel %vm899_vm4, %v865_v50, %v886_v47 }
 0x34b   : > { %v1967_v42 = vpop.permute.xlu1 %1966 }
 0x34c   : > { %v1969_v43 = vunpack.i.h.bf16 %v1967_v42  ;;  %v1968_v19 = vunpack.i.l.bf16 %v1967_v42 }
 0x34e   : > { %v905_v45 = vsel %vm899_vm4, %v868_v9, %v1969_v43  ;;  %v904_v46 = vsel %vm899_vm4, %v867_v22, %v1968_v19  ;;  %v2519_v19 = vld [vmem:[%s913_s15] ss:$0 sm:$0xff]  ;;  %s2653_s15 = scalar_lea.hbm %s2709_s12, %s1761_s16 }
 0x34f   : > { %v917_v48 = vpack.c.bf16 %v905_v45, %v904_v46  ;;  %v888_v49 = vpop.permute.xlu1 %887 }
 0x350   : > { %v2473_v51 = vsel %vm899_vm4, %v866_v44, %v888_v49 }
 0x351   : > { %1836 = vmatpush3.bf16.msra.mxu1 %v917_v48  ;;  %v916_v23 = vpack.c.bf16 %v2473_v51, %v2476_v16 }
 0x352   : > { %1837 = vmatprep.subr.bf16.mxu1 %v2196_v0 }
 0x353   : > { %v1972_v30 = vpop.permute.xlu0 %1971  ;;  %v830_v52 = vpop.permute.xlu1 %829 }
 0x354   : > { %v1974_v54 = vunpack.i.h.bf16 %v1972_v30  ;;  %v1973_v55 = vunpack.i.l.bf16 %v1972_v30  ;;  %v864_v31 = vmul.f32 %v830_v52, %v700_v11 }
 0x355   : > { %1838 = vmatpush3.bf16.msra.mxu1 %v916_v23 }
 0x356   : > { %v900_v56 = vsel %vm899_vm4, %v863_v53, %v1973_v55  ;;  %v901_v57 = vsel %vm899_vm4, %v864_v31, %v1974_v54  ;;  %1839 = vmatprep.subr.bf16.mxu1 %v2196_v0 }
 0x357   : > { %v915_v58 = vpack.c.bf16 %v901_v57, %v900_v56 }
 0x359   : > { %1840 = vmatpush3.bf16.msra.mxu1 %v915_v58 }
 0x35a   : > { %1869 = vmatprep.subr.bf16.mxu1 %v2196_v0 }
 0x35c   : > { %1842 = vmatmul.mubr.msk.bf16.vlgmr.msra.gmra.mxu1 %vm536_vm1, %v2355_v27 }
 0x35d   : > { %1845 = vmatprep.mubr.msk.bf16.mxu1 %vm2197_vm0, %v2196_v0 }
 0x364   : > { %1846 = vmatmul.mubr.msk.bf16.gmra.mxu1 %vm536_vm1, %v2364_v28 }
 0x365   : > { %1849 = vmatprep.mubr.msk.bf16.mxu1 %vm2197_vm0, %v2196_v0 }
 0x36c   : > { %1850 = vmatmul.mubr.msk.bf16.gmra.mxu1 %vm536_vm1, %v2373_v29 }
 0x36d   : > { %1875 = vmatprep.mubr.msk.bf16.mxu1 %vm2197_vm0, %v2196_v0 }
 0x41c   : > { %v952_v60 = vpop.f32.mrf.mxu1 }
 0x41e   : > { %v1843_v61 = vpop.f32.mrf.mxu1 }
 0x420   : > { %v955_v62 = vpop.f32.mrf.mxu1 }
 0x421   : > { %v1975_v63 = vpack.i.bf16 %v955_v62, %v952_v60  ;;  %v999_v1 = vpack.c.bf16 %v955_v62, %v952_v60 }
 0x422   : > { %v1844_v3 = vpop.f32.mrf.mxu1 }
 0x423   : > { %1976 = vrot.lane.b32.xlu1 %v1975_v63, %s2199_s4  ;;  %1857 = vmatprep.mubr.msk.bf16.mxu0 %vm899_vm4, %v999_v1 }
 0x424   : > { %v960_v4 = vpop.f32.mrf.mxu1 }
 0x426   : > { %v1847_v5 = vpop.f32.mrf.mxu1 }
 0x428   : > { %v963_v6 = vpop.f32.mrf.mxu1 }
 0x429   : > { %v1980_v8 = vpack.i.bf16 %v963_v6, %v960_v4  ;;  %v1000_v11 = vpack.c.bf16 %v963_v6, %v960_v4 }
 0x42a   : > { %v1848_v12 = vpop.f32.mrf.mxu1 }
 0x42b   : > { %1981 = vrot.lane.b32.xlu0 %v1980_v8, %s2199_s4  ;;  %1858 = vmatmul.mubr.msk.bf16.vlgmr.msra.gmra.mxu0 %vm899_vm4, %v1000_v11 }
 0x42c   : > { %v968_v14 = vpop.f32.mrf.mxu1 }
 0x42e   : > { %v1851_v15 = vpop.f32.mrf.mxu1 }
 0x430   : > { %v971_v17 = vpop.f32.mrf.mxu1 }
 0x431   : > { %v1985_v20 = vpack.i.bf16 %v971_v17, %v968_v14  ;;  %v1001_v21 = vpack.c.bf16 %v971_v17, %v968_v14 }
 0x432   : > { %v1852_v24 = vpop.f32.mrf.mxu1 }
 0x433   : > { %1986 = vrot.lane.b32.xlu1 %v1985_v20, %s2199_s4  ;;  %1861 = vmatprep.mubr.msk.bf16.mxu0 %vm899_vm4, %v1001_v21 }
 0x495   : > { %v1977_v25 = vpop.permute.xlu1 %1976 }
 0x496   : > { %v1979_v26 = vunpack.i.h.bf16 %v1977_v25  ;;  %v1978_v32 = vunpack.i.l.bf16 %v1977_v25 }
 0x498   : > { %v1002_v33 = vpack.c.bf16 %v1979_v26, %v1978_v32 }
 0x49a   : > { %1862 = vmatmul.mubr.msk.bf16.gmra.mxu0 %vm899_vm4, %v1002_v33 }
 0x49d   : > { %v1982_v2 = vpop.permute.xlu0 %1981 }
 0x49e   : > { %v1984_v7 = vunpack.i.h.bf16 %v1982_v2  ;;  %v1983_v35 = vunpack.i.l.bf16 %v1982_v2 }
 0x4a0   : > { %v1003_v36 = vpack.c.bf16 %v1984_v7, %v1983_v35 }
 0x4a2   : > { %1865 = vmatprep.mubr.msk.bf16.mxu0 %vm899_vm4, %v1003_v36 }
 0x4a5   : > { %v1987_v37 = vpop.permute.xlu1 %1986 }
 0x4a6   : > { %v1989_v10 = vunpack.i.h.bf16 %v1987_v37  ;;  %v1988_v18 = vunpack.i.l.bf16 %v1987_v37 }
 0x4a8   : > { %v1004_v13 = vpack.c.bf16 %v1989_v10, %v1988_v18 }
 0x4aa   : > { %1866 = vmatmul.mubr.msk.bf16.gmra.mxu0 %vm899_vm4, %v1004_v13 }
 0x4eb   : > { %v1859_v38 = vpop.f32.mrf.mxu0 }
 0x4ec   : > { %v2556_v61 = vadd.f32 %v1859_v38, %v2519_v19 }
 0x4ed   : > { %v1075_v39 = vpop.f32.mrf.mxu0 }
 0x4ee   : > { %v2561_v1 = vadd.f32 %v2519_v19, %v1075_v39  ;;  %v1724_v3 = vmul.f32 -1.442695, %v2556_v61 }
 0x4ef   : > { %v1860_v40 = vpop.f32.mrf.mxu0 }
 0x4f0   : > { %v2547_v57 = vadd.f32 %v1860_v40, %v2519_v19  ;;  %v1722_v5 = vmul.f32 -1.442695, %v2561_v1 }
 0x4f1   : > { %v2513_v41 = vpop.f32.mrf.mxu0 }
 0x4f2   : > { %v1725_v62 = vmul.f32 -1.442695, %v2547_v57 }
 0x55a   : > { %v1863_v42 = vpop.f32.mrf.mxu0 }
 0x55b   : > { %v2522_v45 = vadd.f32 %v1863_v42, %v2519_v19 }
 0x55c   : > { %v1091_v22 = vpop.f32.mrf.mxu0 }
 0x55d   : > { %v1728_v23 = vmul.f32 -1.442695, %v2522_v45  ;;  %v2533_v30 = vadd.f32 %v2519_v19, %v1091_v22 }
 0x55e   : > { %v1864_v9 = vpop.f32.mrf.mxu0 }
 0x55f   : > { %v2540_v54 = vadd.f32 %v1864_v9, %v2519_v19  ;;  %v1726_v58 = vmul.f32 -1.442695, %v2533_v30 }
 0x560   : > { %v1094_v43 = vpop.f32.mrf.mxu0 }
 0x561   : > { %v1729_v59 = vmul.f32 -1.442695, %v2540_v54  ;;  %v2553_v60 = vadd.f32 %v2519_v19, %v1094_v43 }
 0x563   : > { %v1727_v63 = vmul.f32 -1.442695, %v2553_v60 }
 0x56a   : > { %v1867_v44 = vpop.f32.mrf.mxu0 }
 0x56b   : > { %v2525_v46 = vadd.f32 %v1867_v44, %v2519_v19 }
 0x56c   : > { %v1107_v47 = vpop.f32.mrf.mxu0 }
 0x56d   : > { %v1732_v48 = vmul.f32 -1.442695, %v2525_v46  ;;  %v2529_v49 = vadd.f32 %v2519_v19, %v1107_v47 }
 0x56e   : > { %v1868_v50 = vpop.f32.mrf.mxu0 }
 0x56f   : > { %v1730_v52 = vmul.f32 -1.442695, %v2529_v49  ;;  %v2537_v53 = vadd.f32 %v1868_v50, %v2519_v19  ;;  %2070 = vpow2.f32 %v1732_v48  ;;  %v1079_v50 = vadd.f32 %v2519_v19, %v2513_v41 }
 0x570   : > { %v1110_v55 = vpop.f32.mrf.mxu0 }
 0x571   : > { %v1733_v31 = vmul.f32 -1.442695, %v2537_v53  ;;  %v2544_v56 = vadd.f32 %v2519_v19, %v1110_v55  ;;  %2072 = vpow2.f32 %v1730_v52 }
 0x572   : > { %2074 = vpow2.f32 %v1728_v23  ;;  %v1723_v23 = vmul.f32 -1.442695, %v1079_v50 }
 0x573   : > { %v1731_v34 = vmul.f32 -1.442695, %v2544_v56  ;;  %2076 = vpow2.f32 %v1733_v31 }
 0x575   : > { %2078 = vpow2.f32 %v1731_v34 }
 0x576   : > { %2080 = vpow2.f32 %v1726_v58 }
 0x577   : > { %2082 = vpow2.f32 %v1729_v59 }
 0x578   : > { %2084 = vpow2.f32 %v1725_v62 }
 0x579   : > { %2086 = vpow2.f32 %v1727_v63 }
 0x57a   : > { %2088 = vpow2.f32 %v1724_v3 }
 0x57c   : > { %v2071_v4 = vpop.eup %2070 }
 0x57d   : > { %v1168_v6 = vadd.f32 1.0, %v2071_v4 }
 0x57e   : > { %v2073_v8 = vpop.eup %2072 }
 0x57f   : > { %v2075_v11 = vpop.eup %2074  ;;  %2090 = vrcp.f32 %v1168_v6  ;;  %v1166_v12 = vadd.f32 1.0, %v2073_v8 }
 0x580   : > { %v2077_v14 = vpop.eup %2076  ;;  %2092 = vpow2.f32 %v1722_v5  ;;  %v1164_v20 = vadd.f32 1.0, %v2075_v11 }
 0x581   : > { %v1169_v15 = vadd.f32 1.0, %v2077_v14  ;;  %2094 = vrcp.f32 %v1166_v12 }
 0x582   : > { %v2079_v17 = vpop.eup %2078 }
 0x583   : > { %v2081_v21 = vpop.eup %2080  ;;  %2096 = vrcp.f32 %v1169_v15  ;;  %v1167_v24 = vadd.f32 1.0, %v2079_v17 }
 0x584   : > { %v2083_v25 = vpop.eup %2082  ;;  %2098 = vrcp.f32 %v1164_v20  ;;  %v1162_v26 = vadd.f32 1.0, %v2081_v21 }
 0x585   : > { %v2085_v32 = vpop.eup %2084  ;;  %v1165_v33 = vadd.f32 1.0, %v2083_v25  ;;  %2100 = vrcp.f32 %v1167_v24 }
 0x586   : > { %v2087_v2 = vpop.eup %2086  ;;  %v1161_v7 = vadd.f32 1.0, %v2085_v32  ;;  %2102 = vrcp.f32 %v1162_v26 }
 0x587   : > { %v2089_v35 = vpop.eup %2088  ;;  %2104 = vrcp.f32 %v1165_v33  ;;  %v1163_v36 = vadd.f32 1.0, %v2087_v2 }
 0x588   : > { %2106 = vrcp.f32 %v1161_v7  ;;  %v1160_v13 = vadd.f32 1.0, %v2089_v35 }
 0x589   : > { %2108 = vrcp.f32 %v1163_v36 }
 0x58a   : > { %2110 = vrcp.f32 %v1160_v13 }
 0x58c   : > { %v2091_v37 = vpop.eup %2090 }
 0x58d   : > { %1226 = vrot.lane.b32.xlu0 %v2091_v37, %s2199_s4  ;;  %v2093_v10 = vpop.eup %2092 }
 0x58e   : > { %v2095_v18 = vpop.eup %2094  ;;  %v1158_v40 = vadd.f32 1.0, %v2093_v10 }
 0x590   : > { %v2097_v38 = vpop.eup %2096  ;;  %2112 = vrcp.f32 %v1158_v40 }
 0x591   : > { %1228 = vrot.lane.b32.xlu1 %v2097_v38, %s2199_s4  ;;  %1222 = vrot.lane.b32.xlu0 %v2095_v18, %s2199_s4  ;;  %v2099_v39 = vpop.eup %2098  ;;  %2114 = vpow2.f32 %v1723_v23 }
 0x592   : > { %v2101_v42 = vpop.eup %2100 }
 0x593   : > { %v2103_v22 = vpop.eup %2102 }
 0x594   : > { %v2105_v9 = vpop.eup %2104 }
 0x595   : > { %1224 = vrot.lane.b32.xlu1 %v2101_v42, %s2199_s4  ;;  %1218 = vrot.lane.b32.xlu0 %v2099_v39, %s2199_s4  ;;  %v2107_v43 = vpop.eup %2106 }
 0x596   : > { %v2109_v44 = vpop.eup %2108 }
 0x597   : > { %v2111_v47 = vpop.eup %2110 }
 0x599   : > { %1220 = vrot.lane.b32.xlu1 %v2105_v9, %s2199_s4  ;;  %1214 = vrot.lane.b32.xlu0 %v2103_v22, %s2199_s4 }
 0x59d   : > { %1216 = vrot.lane.b32.xlu1 %v2109_v44, %s2199_s4  ;;  %1212 = vrot.lane.b32.xlu0 %v2107_v43, %s2199_s4  ;;  %v2113_v48 = vpop.eup %2112 }
 0x59e   : > { %v2115_v52 = vpop.eup %2114 }
 0x59f   : > { %v1159_v55 = vadd.f32 1.0, %v2115_v52 }
 0x5a1   : > { %1210 = vrot.lane.b32.xlu1 %v2111_v47, %s2199_s4  ;;  %2116 = vrcp.f32 %v1159_v55 }
 0x5a5   : > { %1206 = vrot.lane.b32.xlu1 %v2113_v48, %s2199_s4 }
 0x5ff   : > { %v1227_v31 = vpop.permute.xlu0 %1226 }
 0x600   : > { %v1252_v59 = vmul.f32 %v1227_v31, %v2525_v46 }
 0x603   : > { %v1229_v58 = vpop.permute.xlu1 %1228  ;;  %v1223_v34 = vpop.permute.xlu0 %1222 }
 0x604   : > { %v1253_v62 = vmul.f32 %v1229_v58, %v2537_v53  ;;  %v1250_v63 = vmul.f32 %v1223_v34, %v2529_v49  ;;  %v2117_v53 = vpop.eup %2116 }
 0x606   : > { %v1990_v3 = vpack.i.bf16 %v1253_v62, %v1252_v59  ;;  %1264 = vrot.lane.b32.xlu1 %v1250_v63, %s2200_s27 }
 0x607   : > { %v1225_v4 = vpop.permute.xlu1 %1224  ;;  %v1219_v41 = vpop.permute.xlu0 %1218 }
 0x608   : > { %1991 = vrot.lane.b32.xlu0 %v1990_v3, %s2200_s27  ;;  %v1251_v19 = vmul.f32 %v1225_v4, %v2544_v56  ;;  %v1248_v6 = vmul.f32 %v1219_v41, %v2522_v45 }
 0x60b   : > { %v1221_v5 = vpop.permute.xlu1 %1220  ;;  %v1215_v11 = vpop.permute.xlu0 %1214 }
 0x60c   : > { %v1249_v8 = vmul.f32 %v1221_v5, %v2540_v54  ;;  %1266 = vrot.lane.b32.xlu0 %v1251_v19, %s2200_s27  ;;  %v1246_v56 = vmul.f32 %v1215_v11, %v2533_v30 }
 0x60e   : > { %v1995_v46 = vpack.i.bf16 %v1249_v8, %v1248_v6 }
 0x60f   : > { %v1217_v49 = vpop.permute.xlu1 %1216  ;;  %v1213_v14 = vpop.permute.xlu0 %1212 }
 0x610   : > { %1208 = vrot.lane.b32.xlu0 %v2117_v53, %s2199_s4  ;;  %1996 = vrot.lane.b32.xlu1 %v1995_v46, %s2200_s27  ;;  %v1247_v45 = vmul.f32 %v1217_v49, %v2553_v60  ;;  %v1245_v21 = vmul.f32 %v1213_v14, %v2547_v57 }
 0x613   : > { %v1211_v12 = vpop.permute.xlu1 %1210 }
 0x614   : > { %v1244_v2 = vmul.f32 %v1211_v12, %v2556_v61 }
 0x617   : > { %v1207_v15 = vpop.permute.xlu1 %1206 }
 0x618   : > { %v1242_v36 = vmul.f32 %v1207_v15, %v2561_v1  ;;  %v2020_v1 = vld [vmem:[%s1285_s23 + $0x8] sm:$0xff]  }
 0x619   : > { %1887 = vmatprep.subr.bf16.mxu0 %v2020_v1 }
 0x61a   : > { %1888 = vmatpush3.bf16.msra.mxu0 %v2020_v1 }
 0x678   : > { %v1265_v26 = vpop.permute.xlu1 %1264 }
 0x679   : > { %v2599_v30 = vsel %vm899_vm4, %v1244_v2, %v1265_v26 }
 0x67a   : > { %v1992_v17 = vpop.permute.xlu0 %1991 }
 0x67b   : > { %v1994_v20 = vunpack.i.h.bf16 %v1992_v17  ;;  %v1993_v54 = vunpack.i.l.bf16 %v1992_v17 }
 0x67d   : > { %v1283_v24 = vsel %vm899_vm4, %v1247_v45, %v1994_v20  ;;  %v1282_v25 = vsel %vm899_vm4, %v1246_v56, %v1993_v54  ;;  %v1738_v45 = vld [vmem:[%s1290_s14] ss:$0 sm:$0xff] }
 0x67e   : > { %v1294_v32 = vpack.c.bf16 %v1283_v24, %v1282_v25  ;;  %v1267_v33 = vpop.permute.xlu0 %1266 }
 0x67f   : > { %v2596_v7 = vsel %vm899_vm4, %v1245_v21, %v1267_v33 }
 0x680   : > { %1870 = vmatpush3.bf16.msra.mxu1 %v1294_v32  ;;  %v1293_v57 = vpack.c.bf16 %v2596_v7, %v2599_v30 }
 0x681   : > { %1871 = vmatprep.subr.bf16.mxu1 %v2196_v0 }
 0x682   : > { %v1209_v60 = vpop.permute.xlu0 %1208  ;;  %v1997_v35 = vpop.permute.xlu1 %1996 }
 0x683   : > { %v1243_v37 = vmul.f32 %v1209_v60, %v1079_v50  ;;  %v1999_v10 = vunpack.i.h.bf16 %v1997_v35  ;;  %v1998_v61 = vunpack.i.l.bf16 %v1997_v35 }
 0x684   : > { %1872 = vmatpush3.bf16.msra.mxu1 %v1293_v57 }
 0x685   : > { %v1279_v18 = vsel %vm899_vm4, %v1243_v37, %v1999_v10  ;;  %v1278_v13 = vsel %vm899_vm4, %v1242_v36, %v1998_v61  ;;  %1873 = vmatprep.subr.bf16.mxu1 %v2196_v0 }
 0x686   : > { %v1292_v38 = vpack.c.bf16 %v1279_v18, %v1278_v13 }
 0x688   : > { %1874 = vmatpush3.bf16.msra.mxu1 %v1292_v38 }
 0x68b   : > { %1876 = vmatmul.mubr.msk.bf16.vlgmr.msra.gmra.mxu1 %vm536_vm1, %v2355_v27  ;;  %v2021_v27 = vld [vmem:[%s1285_s23] sm:$0xff]   ;;  %s2138_s23 = sshll.u32 %s2201_s19, 4  ;;  %s2139_s23 = int_to_ptr.vmem [resolvable:$false] %s2138_s23 }
 0x68c   : > { %1879 = vmatprep.mubr.msk.bf16.mxu1 %vm2197_vm0, %v2196_v0  ;;  %1889 = vmatprep.subr.bf16.mxu0 %v2021_v27  ;;  %s2140_s30 = scalar_lea.vmem %s2139_s23, 512 }
 0x68d   : > { %1890 = vmatpush3.bf16.msra.mxu0 %v2021_v27 }
 0x693   : > { %1880 = vmatmul.mubr.msk.bf16.gmra.mxu1 %vm536_vm1, %v2364_v28 }
 0x694   : > { %1883 = vmatprep.mubr.msk.bf16.mxu1 %vm2197_vm0, %v2196_v0 }
 0x69b   : > { %1884 = vmatmul.mubr.msk.bf16.gmra.mxu1 %vm536_vm1, %v2373_v29 }
 0x74b   : > { %v1329_v39 = vpop.f32.mrf.mxu1 }
 0x74d   : > { %v1877_v40 = vpop.f32.mrf.mxu1 }
 0x74f   : > { %v1332_v28 = vpop.f32.mrf.mxu1 }
 0x750   : > { %v2000_v42 = vpack.i.bf16 %v1332_v28, %v1329_v39  ;;  %v1376_v22 = vpack.c.bf16 %v1332_v28, %v1329_v39 }
 0x751   : > { %v1878_v0 = vpop.f32.mrf.mxu1 }
 0x752   : > { %2001 = vrot.lane.b32.xlu0 %v2000_v42, %s2199_s4  ;;  %1891 = vmatprep.mubr.msk.bf16.mxu0 %vm899_vm4, %v1376_v22 }
 0x753   : > { %v1337_v29 = vpop.f32.mrf.mxu1 }
 0x755   : > { %v1881_v9 = vpop.f32.mrf.mxu1 }
 0x757   : > { %v1340_v43 = vpop.f32.mrf.mxu1 }
 0x758   : > { %v2005_v44 = vpack.i.bf16 %v1340_v43, %v1337_v29  ;;  %v1377_v47 = vpack.c.bf16 %v1340_v43, %v1337_v29 }
 0x759   : > { %v1882_v48 = vpop.f32.mrf.mxu1 }
 0x75a   : > { %1892 = vmatmul.mubr.msk.bf16.vlgmr.msra.gmra.mxu0 %vm899_vm4, %v1377_v47  ;;  %2006 = vrot.lane.b32.xlu1 %v2005_v44, %s2199_s4  ;;  %v1545_v44 = vmax.f32 %v2476_v16, %v2599_v30 }
 0x75b   : > { %v1345_v50 = vpop.f32.mrf.mxu1 }
 0x75d   : > { %v1885_v23 = vpop.f32.mrf.mxu1 }
 0x75f   : > { %v1348_v52 = vpop.f32.mrf.mxu1 }
 0x760   : > { %v2010_v55 = vpack.i.bf16 %v1348_v52, %v1345_v50  ;;  %v1378_v31 = vpack.c.bf16 %v1348_v52, %v1345_v50 }
 0x761   : > { %v1886_v58 = vpop.f32.mrf.mxu1 }
 0x762   : > { %2011 = vrot.lane.b32.xlu0 %v2010_v55, %s2199_s4  ;;  %1895 = vmatprep.mubr.msk.bf16.mxu0 %vm899_vm4, %v1378_v31  ;;  %v1546_v55 = vmax.f32 %v2473_v51, %v2596_v7 }
 0x7c4   : > { %v2002_v34 = vpop.permute.xlu0 %2001 }
 0x7c5   : > { %v2004_v59 = vunpack.i.h.bf16 %v2002_v34  ;;  %v2003_v62 = vunpack.i.l.bf16 %v2002_v34 }
 0x7c7   : > { %v1379_v63 = vpack.c.bf16 %v2004_v59, %v2003_v62 }
 0x7c9   : > { %1896 = vmatmul.mubr.msk.bf16.gmra.mxu0 %vm899_vm4, %v1379_v63 }
 0x7cc   : > { %v2007_v3 = vpop.permute.xlu1 %2006 }
 0x7cd   : > { %v2009_v4 = vunpack.i.h.bf16 %v2007_v3  ;;  %v2008_v41 = vunpack.i.l.bf16 %v2007_v3 }
 0x7cf   : > { %v1380_v19 = vpack.c.bf16 %v2009_v4, %v2008_v41 }
 0x7d1   : > { %1899 = vmatprep.mubr.msk.bf16.mxu0 %vm899_vm4, %v1380_v19 }
 0x7d4   : > { %v2012_v5 = vpop.permute.xlu0 %2011 }
 0x7d5   : > { %v2014_v6 = vunpack.i.h.bf16 %v2012_v5  ;;  %v2013_v8 = vunpack.i.l.bf16 %v2012_v5 }
 0x7d7   : > { %v1381_v46 = vpack.c.bf16 %v2014_v6, %v2013_v8 }
 0x7d9   : > { %1900 = vmatmul.mubr.msk.bf16.gmra.mxu0 %vm899_vm4, %v1381_v46 }
 0x81a   : > { %v1893_v53 = vpop.f32.mrf.mxu0 }
 0x81b   : > { %v1459_v20 = vadd.f32 %v1893_v53, %v1738_v45 }
 0x81c   : > { %v1452_v49 = vpop.f32.mrf.mxu0 }
 0x81d   : > { %v1747_v21 = vmul.f32 -1.442695, %v1459_v20 }
 0x81e   : > { %v1894_v11 = vpop.f32.mrf.mxu0 }
 0x81f   : > { %v1462_v24 = vadd.f32 %v1894_v11, %v1738_v45  ;;  %2118 = vpow2.f32 %v1747_v21 }
 0x820   : > { %v1454_v12 = vpop.f32.mrf.mxu0 }
 0x821   : > { %v1748_v2 = vmul.f32 -1.442695, %v1462_v24 }
 0x82c   : > { %v2119_v36 = vpop.eup %2118 }
 0x82d   : > { %v1503_v61 = vadd.f32 1.0, %v2119_v36 }
 0x889   : > { %v1897_v14 = vpop.f32.mrf.mxu0 }
 0x88b   : > { %v1466_v15 = vpop.f32.mrf.mxu0 }
 0x88d   : > { %v1898_v17 = vpop.f32.mrf.mxu0 }
 0x88f   : > { %v1468_v56 = vpop.f32.mrf.mxu0 }
 0x899   : > { %v1901_v54 = vpop.f32.mrf.mxu0 }
 0x89b   : > { %v1478_v25 = vpop.f32.mrf.mxu0 }
 0x89c   : > { %v1479_v26 = vadd.f32 %v1738_v45, %v1478_v25 }
 0x89d   : > { %v1902_v32 = vpop.f32.mrf.mxu0 }
 0x89e   : > { %v1749_v33 = vmul.f32 -1.442695, %v1479_v26 }
 0x89f   : > { %v1481_v57 = vpop.f32.mrf.mxu0 }
 0x8a0   : > { %2120 = vpow2.f32 %v1749_v33  ;;  %v1482_v60 = vadd.f32 %v1738_v45, %v1481_v57 }
 0x8a1   : > { %2122 = vpow2.f32 %v1748_v2 }
 0x8a2   : > { %v1750_v35 = vmul.f32 -1.442695, %v1482_v60 }
 0x8a4   : > { %2124 = vpow2.f32 %v1750_v35 }
 0x8ad   : > { %v2121_v37 = vpop.eup %2120 }
 0x8ae   : > { %v1505_v10 = vadd.f32 1.0, %v2121_v37  ;;  %v2123_v18 = vpop.eup %2122 }
 0x8af   : > { %v1504_v1 = vadd.f32 1.0, %v2123_v18 }
 0x8b0   : > { %2126 = vrcp.f32 %v1505_v10 }
 0x8b1   : > { %v2125_v13 = vpop.eup %2124  ;;  %2128 = vrcp.f32 %v1503_v61 }
 0x8b2   : > { %v1506_v38 = vadd.f32 1.0, %v2125_v13 }
 0x8b4   : > { %2130 = vrcp.f32 %v1506_v38 }
 0x8b5   : > { %2132 = vrcp.f32 %v1504_v1 }
 0x8bd   : > { %v2127_v27 = vpop.eup %2126 }
 0x8be   : > { %1523 = vrot.lane.b32.xlu1 %v2127_v27, %s2199_s4  ;;  %v2129_v39 = vpop.eup %2128 }
 0x8c1   : > { %v2131_v40 = vpop.eup %2130 }
 0x8c2   : > { %1525 = vrot.lane.b32.xlu0 %v2131_v40, %s2199_s4  ;;  %1519 = vrot.lane.b32.xlu1 %v2129_v39, %s2199_s4  ;;  %v2133_v28 = vpop.eup %2132 }
 0x8c6   : > { %1521 = vrot.lane.b32.xlu0 %v2133_v28, %s2199_s4  ;;  %s446_s4 = scalar_lea.vmem [#allocation2], %s1670_s28 }
 0x8c7   : > { %s1566_s29 = sshll.u32 %s446_s4, 4  ;;  %s2655_s29 = int_to_ptr.vmem [resolvable:$true] %s1566_s29 }
 0x8c8   : > { %s2134_s20 = scalar_lea.vmem %s2655_s29, 256  ;;  %p2141_p2 = scmp.lt.s32.totalorder %s2655_s29, %s2139_s23 }
 0x8c9   : > { %p2135_p13 = scmp.ne.s32.totalorder %s2655_s29, %s2134_s20  ;;  %p2142_p3 = scmp.lt.s32.totalorder %s2140_s30, %s2134_s20 }
 0x8cb   : > { %p2136_p0 = pnand %p2135_p13, %p2307_p5  ;;  %p2143_p4 = por %p2142_p3, %p2141_p2 }
 0x8cd   : > { %p2137_p1 = pneg %p2136_p0 }
 0x8cf   : > { %p2144_p7 = pnand %p2143_p4, %p2137_p1 }
 0x930   : > { %v1524_v42 = vpop.permute.xlu1 %1523 }
 0x931   : > { %v1533_v22 = vmul.f32 %v1524_v42, %v1479_v26 }
 0x933   : > { %1537 = vrot.lane.b32.xlu1 %v1533_v22, %s2200_s27 }
 0x934   : > { %v1526_v0 = vpop.permute.xlu0 %1525  ;;  %v1520_v9 = vpop.permute.xlu1 %1519 }
 0x935   : > { %v1534_v29 = vmul.f32 %v1526_v0, %v1482_v60  ;;  %v1531_v43 = vmul.f32 %v1520_v9, %v1459_v20 }
 0x937   : > { %1539 = vrot.lane.b32.xlu0 %v1534_v29, %s2200_s27 }
 0x938   : > { %v1522_v47 = vpop.permute.xlu0 %1521 }
 0x939   : > { %v1532_v52 = vmul.f32 %v1522_v47, %v1462_v24 }
 0x9a5   : > { %v1538_v48 = vpop.permute.xlu1 %1537 }
 0x9a6   : > { %v1543_v50 = vsel %vm899_vm4, %v1531_v43, %v1538_v48 }
 0x9a7   : > { %v1547_v23 = vmax.f32 %v1545_v44, %v1543_v50 }
 0x9a9   : > { %1550 = vst.msk [vmem:[%s446_s4] sm:$0xff] %vm1549_vm5, %v1547_v23  ;;  %v1540_v31 = vpop.permute.xlu0 %1539 }
 0x9aa   : > { %v1544_v58 = vsel %vm899_vm4, %v1532_v52, %v1540_v31 }
 0x9ab   : > { %v1548_v16 = vmax.f32 %v1546_v55, %v1544_v58 }
 0x9ad   : > { %1551 = vst.msk [vmem:[%s446_s4 + $0x8] sm:$0xff] %vm1549_vm5, %v1548_v16 }
 0x9ae   : > { %2147 = shalt.err (!%p2144_p7)
}
 0x9af   : > { %s2148_s26 = scalar_lea.hbm %s2653_s15, 256  ;;  %s2152_s28 = scalar_lea.hbm %s2709_s12, 1536 }
 0x9b0   : > { %p2149_p8 = scmp.ne.s32.totalorder %s2653_s15, %s2148_s26  ;;  %p2153_p11 = scmp.lt.s32.totalorder %s2653_s15, %s2709_s12 }
 0x9b1   : > { %p2154_p12 = scmp.lt.s32.totalorder %s2152_s28, %s2148_s26 }
 0x9b2   : > { %p2150_p9 = pnand %p2149_p8, %p2307_p5 }
 0x9b3   : > { %p2155_p13 = por %p2154_p12, %p2153_p11 }
 0x9b4   : > { %p2151_p10 = pneg %p2150_p9 }
 0x9b6   : > { %p2156_p0 = pnand %p2155_p13, %p2151_p10 }
 0x9b8   : > { %2159 = shalt.err (!%p2156_p0)
}
 0x9b9   : > { %s2202_s27 = smov 128   ;;  %s2203_s17 = smov 8  }
 0x9ba   : > { %1904 = dma.vmem_to_hbm [thread:$0]  (%p2307_p5), %s2655_s29, 256, %s2653_s15, %s2657_s25, %s2202_s27, %s2202_s27, %s2203_s17  }
 0x9bb PF: > { %p1910_p1 = scmp.ge.s32.totalorder %s2194_s24, 2  ;;  %s1581_s19 = sand.u32 1, %s2182_s21  }
 0x9bc   : > { %s1582_s23 = scalar_lea.sflag [#allocation3], %s1581_s19 }
 0x9bd   : > { %p1907_p2 = pnand %p1910_p1, %p2311_p6 }
 0x9bf   : > { %p1908_p3 = pneg %p1907_p2 }
 0x9c1   : > { %2177 = dma.done.wait (%p1908_p3), %s1582_s23, 256  }
 0x9c2   : > { %2179 = vsyncadd (%p1908_p3), %s1582_s23, 4294967040  ;;  %s2723_s24 = sld [smem:[#allocation6_spill]]  ;;  %s2726_s21 = smov %s2186_s22 }
 0x9c3   : > { %s2724_s30 = sld [smem:[#allocation5_spill]] }
 0x9c4   : > { %s2725_s23 = sld [smem:[#allocation7_spill]] }
 0x9c8   : > { %p22_p4 = scmp.ge.s32.totalorder %s2723_s24, 8  }
 0x9c9   : > { %s2727_s22 = smov %s2724_s30 }
 0x9ca   :  { %24 = sbr.rel (!%p22_p4) target bundleno = 5 (0x5), region = 118 }
 0x9cf   :  { %1587 = vsyncpa [#allocation3], 1 }
 0x9d0   :  { %1589 = vsyncpa [#allocation3 + $0x1], 1 }

</bundles_post_ra>
